<compile_context>
chip_gen: v7x
topology: tpu7x:2x2x1
jax: 0.10.0
libtpu: 0.0.40
codegen_flags: <defaults>
</compile_context>

<pallas_src>
import jax
import jax.numpy as jnp
from jax.experimental import pallas as pl
from jax.experimental.pallas import tpu as pltpu

_LANE = 128
_F32_BYTES = 4


def _round_up(n, m):
    return (n + m - 1) // m * m


def dgm_kernel(x_ref, s_ref, wx_ref, ws_ref, whs_ref, ball_ref, out_ref):
    x = x_ref[...]                      # [TB, Dx]
    s = s_ref[...]                      # [TB, Ds]
    ds = s.shape[-1]

    # Lane-dense fused pre-activations for all four gates: [TB, 4*Ds].
    # Ws is zero-padded over the H block, so both adds (and the bias add) are
    # full-slab VPU ops; the extra zero MXU columns are free at K = Ds.
    p = (jnp.dot(x, wx_ref[...], preferred_element_type=jnp.float32)
         + jnp.dot(s, ws_ref[...], preferred_element_type=jnp.float32)
         + ball_ref[...])

    # activation='Tanh' (module default). tanh on the whole slab goes to the
    # EUP; the H quarter of `t` is simply discarded (recomputed below with the
    # missing (S*R) @ Wh_s contribution).
    t = jnp.tanh(p)
    z = t[:, :ds]
    g = t[:, ds:2 * ds]
    r = t[:, 2 * ds:3 * ds]

    # H gate: cat([x, S*R]) @ W_h + b_h == (x @ Wh_x + b_h, already in p) + (S*R) @ Wh_s.
    h = jnp.tanh(p[:, 3 * ds:] + jnp.dot(
        s * r, whs_ref[...], preferred_element_type=jnp.float32))

    out_ref[...] = ((1.0 - g) * h + z * s).astype(out_ref.dtype)


def _vmem_capacity_bytes():
    try:
        return int(pltpu.get_tpu_info().vmem_capacity_bytes)
    except Exception:
        return 64 << 20  # conservative fallback: v7x per-TensorCore VMEM


def _bytes_per_batch_row():
    # x, S, out each pad to 128 lanes of f32 in VMEM and are double-buffered by
    # the pipeline; add ~2 KiB/row for in-kernel temporaries (p, t, s*r, h, ...).
    return 2 * 3 * _LANE * _F32_BYTES + 2048


def _choose_tile_b(B, vmem_cap, max_tile_b):
    per_row = _bytes_per_batch_row()
    tile = (vmem_cap // 2) // per_row           # use at most ~half of VMEM
    tile = min(tile, max_tile_b)
    tile = min(tile, max(pl.cdiv(B, 4), 512))   # keep >=4 grid steps (megacore)
    tile = max(1, min(tile, B))
    return _round_up(tile, 8)


def dgm_layer(x, S, params, *, max_tile_b=8192, tile_b=None):
    """x: [B, Dx], S: [B, Ds], params: dict of split/transposed gate weights."""
    x = x.astype(jnp.float32)
    S = S.astype(jnp.float32)
    B, Dx = x.shape
    _, Ds = S.shape

    # Fuse weights / biases along the output (lane) dimension once per call.
    wx_all = jnp.concatenate(
        [params["wzx"], params["wgx"], params["wrx"], params["whx"]], axis=1)
    # Zero H block so the S-side slab is 4*Ds wide (lane-dense adds in-kernel).
    ws_all = jnp.concatenate(
        [params["wzs"], params["wgs"], params["wrs"],
         jnp.zeros_like(params["whs"])], axis=1)
    whs = params["whs"]
    b_all = jnp.concatenate(
        [params["bz"], params["bg"], params["br"], params["bh"]], axis=1)

    vmem_cap = _vmem_capacity_bytes()
    if tile_b is None:
        tile_b = _choose_tile_b(B, vmem_cap, max_tile_b)
    else:
        tile_b = _round_up(max(1, min(tile_b, B)), 8)

    # Scoped VMEM limit from the actual footprint: streamed tiles + resident
    # weights + slack, capped below physical VMEM (64 MiB v7x, 128 MiB v5e/v6e).
    weight_bytes = (wx_all.size + ws_all.size + whs.size + b_all.size) * _F32_BYTES
    vmem_limit = tile_b * _bytes_per_batch_row() + weight_bytes + (2 << 20)
    vmem_limit = int(max(16 << 20, min(vmem_limit, vmem_cap - (8 << 20))))

    # No wrapper-side padding: ragged last block is handled by Pallas' masked
    # edge-block DMA (out-of-range input rows are garbage but row-independent;
    # their output writes are dropped).
    grid = (pl.cdiv(B, tile_b),)

    def batch_spec(d):
        return pl.BlockSpec((tile_b, d), lambda i: (i, 0))

    def const_spec(r, c):
        # Constant block index -> weights stay VMEM resident across grid steps.
        return pl.BlockSpec((r, c), lambda i: (0, 0))

    return pl.pallas_call(
        dgm_kernel,
        out_shape=jax.ShapeDtypeStruct((B, Ds), jnp.float32),
        grid=grid,
        in_specs=[
            batch_spec(Dx),            # x       (streamed per batch tile)
            batch_spec(Ds),            # S       (streamed per batch tile)
            const_spec(Dx, 4 * Ds),    # Wx_all  (resident)
            const_spec(Ds, 4 * Ds),    # Ws_all  (resident, H block zeroed)
            const_spec(Ds, Ds),        # Wh_s    (resident)
            const_spec(1, 4 * Ds),     # b_all   (resident)
        ],
        out_specs=batch_spec(Ds),
        compiler_params=pltpu.CompilerParams(
            dimension_semantics=("parallel",),   # v7x megacore sharding
            vmem_limit_bytes=vmem_limit,
        ),
    )(x, S, wx_all, ws_all, whs, b_all)


def init_params(key, dim_x, dim_S):
    """Deterministic init mimicking nn.Linear's U(-1/sqrt(in), 1/sqrt(in))."""
    nIn = dim_x + dim_S
    bound = 1.0 / jnp.sqrt(jnp.float32(nIn))
    keys = jax.random.split(key, 8)
    params = {}
    for gate_name, (kw, kb) in zip(
            ["z", "g", "r", "h"],
            [(keys[0], keys[1]), (keys[2], keys[3]),
             (keys[4], keys[5]), (keys[6], keys[7])]):
        # PyTorch weight is [out, in]; store transposed [in, out] and split rows
        # so cat([x, S]) @ W.T == x @ Wx + S @ Ws.
        w_t = jax.random.uniform(kw, (nIn, dim_S), jnp.float32, -bound, bound)
        b = jax.random.uniform(kb, (1, dim_S), jnp.float32, -bound, bound)
        params[f"w{gate_name}x"] = w_t[:dim_x, :]
        params[f"w{gate_name}s"] = w_t[dim_x:, :]
        params[f"b{gate_name}"] = b
    return params


def dgm_reference(x, S, p):
    """Plain-JAX reference of the PyTorch forward (for verification)."""
    def gate(wx, ws, b, s_in):
        return jnp.tanh(x @ wx + s_in @ ws + b)
    Z = gate(p["wzx"], p["wzs"], p["bz"], S)
    G = gate(p["wgx"], p["wgs"], p["bg"], S)
    R = gate(p["wrx"], p["wrs"], p["br"], S)
    H = gate(p["whx"], p["whs"], p["bh"], S * R)
    return (1.0 - G) * H + Z * S


if __name__ == "__main__":
    dim_x, dim_S = 16, 32
    key = jax.random.PRNGKey(0)
    kx, ks, kp = jax.random.split(key, 3)
    params = init_params(kp, dim_x, dim_S)

    # Test 1: small batch, single tile / single grid step.
    B = 8
    x = jax.random.normal(kx, (B, dim_x), jnp.float32)
    S = jax.random.normal(ks, (B, dim_S), jnp.float32)
    out = dgm_layer(x, S, params)
    jax.block_until_ready(out)
    ref = dgm_reference(x, S, params)
    assert out.shape == (B, dim_S)
    assert jnp.allclose(out, ref, atol=5e-5, rtol=5e-5), \
        "mismatch vs reference (single tile)"

    # Test 2: multi-tile grid with a ragged last block (B not a multiple of
    # tile_b, no wrapper-side padding): grid = (4,), last block has 2 valid rows.
    B2 = 50
    kx2, ks2 = jax.random.split(jax.random.PRNGKey(1), 2)
    x2 = jax.random.normal(kx2, (B2, dim_x), jnp.float32)
    S2 = jax.random.normal(ks2, (B2, dim_S), jnp.float32)
    out2 = dgm_layer(x2, S2, params, tile_b=16)
    jax.block_until_ready(out2)
    ref2 = dgm_reference(x2, S2, params)
    assert out2.shape == (B2, dim_S)
    assert jnp.allclose(out2, ref2, atol=5e-5, rtol=5e-5), \
        "mismatch vs reference (ragged multi-tile)"

    print("KERNEL_OK")
</pallas_src>

<mosaic_0001>
module attributes {stable_mosaic.version = 11 : i64} {
  func.func @dgm_kernel(%arg0: i32, %arg1: memref<8x16xf32, #tpu.memory_space<vmem>>, %arg2: memref<8x32xf32, #tpu.memory_space<vmem>>, %arg3: memref<16x128xf32, #tpu.memory_space<vmem>>, %arg4: memref<32x128xf32, #tpu.memory_space<vmem>>, %arg5: memref<32x32xf32, #tpu.memory_space<vmem>>, %arg6: memref<1x128xf32, #tpu.memory_space<vmem>>, %arg7: memref<8x32xf32, #tpu.memory_space<vmem>>) attributes {dimension_semantics = [#tpu.dimension_semantics<parallel>], iteration_bounds = array<i64: 1>, scalar_prefetch = 0 : i64, scratch_operands = 0 : i64, tpu.core_type = #tpu.core_type<tc>, window_params = [{transform_indices = @transform_0, window_bounds = array<i64: 8, 16>}, {transform_indices = @transform_1, window_bounds = array<i64: 8, 32>}, {pipeline_mode = #tpu.pipeline_mode<synchronous>, transform_indices = @transform_2, window_bounds = array<i64: 16, 128>}, {pipeline_mode = #tpu.pipeline_mode<synchronous>, transform_indices = @transform_3, window_bounds = array<i64: 32, 128>}, {pipeline_mode = #tpu.pipeline_mode<synchronous>, transform_indices = @transform_4, window_bounds = array<i64: 32, 32>}, {pipeline_mode = #tpu.pipeline_mode<synchronous>, transform_indices = @transform_5, window_bounds = array<i64: 1, 128>}, {transform_indices = @transform_6, window_bounds = array<i64: 8, 32>}]} {
    %c0 = arith.constant 0 : index
    %c0_0 = arith.constant 0 : index
    %0 = vector.load %arg1[%c0, %c0_0] : memref<8x16xf32, #tpu.memory_space<vmem>>, vector<8x16xf32>
    %c0_1 = arith.constant 0 : index
    %c0_2 = arith.constant 0 : index
    %1 = vector.load %arg2[%c0_1, %c0_2] : memref<8x32xf32, #tpu.memory_space<vmem>>, vector<8x32xf32>
    %c0_3 = arith.constant 0 : index
    %c0_4 = arith.constant 0 : index
    %2 = vector.load %arg3[%c0_3, %c0_4] : memref<16x128xf32, #tpu.memory_space<vmem>>, vector<16x128xf32>
    %cst = arith.constant dense<0.000000e+00> : vector<8x128xf32>
    %3 = tpu.matmul %0, %2, %cst {dimension_numbers = #tpu.dot_dimension_numbers<[1], [0], [0], [1], [0, 0, 1, 1], [], []>} : vector<8x16xf32>, vector<16x128xf32>, vector<8x128xf32> -> vector<8x128xf32>
    %c0_5 = arith.constant 0 : index
    %c0_6 = arith.constant 0 : index
    %4 = vector.load %arg4[%c0_5, %c0_6] : memref<32x128xf32, #tpu.memory_space<vmem>>, vector<32x128xf32>
    %cst_7 = arith.constant dense<0.000000e+00> : vector<8x128xf32>
    %5 = tpu.matmul %1, %4, %cst_7 {dimension_numbers = #tpu.dot_dimension_numbers<[1], [0], [0], [1], [0, 0, 1, 1], [], []>} : vector<8x32xf32>, vector<32x128xf32>, vector<8x128xf32> -> vector<8x128xf32>
    %6 = arith.addf %3, %5 : vector<8x128xf32>
    %c0_8 = arith.constant 0 : index
    %c0_9 = arith.constant 0 : index
    %7 = vector.load %arg6[%c0_8, %c0_9] : memref<1x128xf32, #tpu.memory_space<vmem>>, vector<1x128xf32>
    %8 = vector.broadcast %7 : vector<1x128xf32> to vector<8x128xf32>
    %9 = arith.addf %6, %8 : vector<8x128xf32>
    %10 = math.tanh %9 : vector<8x128xf32>
    %11 = vector.extract_strided_slice %10 {offsets = [0, 0], sizes = [8, 32], strides = [1, 1]} : vector<8x128xf32> to vector<8x32xf32>
    %12 = vector.extract_strided_slice %10 {offsets = [0, 32], sizes = [8, 32], strides = [1, 1]} : vector<8x128xf32> to vector<8x32xf32>
    %13 = vector.extract_strided_slice %10 {offsets = [0, 64], sizes = [8, 32], strides = [1, 1]} : vector<8x128xf32> to vector<8x32xf32>
    %14 = vector.extract_strided_slice %9 {offsets = [0, 96], sizes = [8, 32], strides = [1, 1]} : vector<8x128xf32> to vector<8x32xf32>
    %15 = arith.mulf %1, %13 : vector<8x32xf32>
    %c0_10 = arith.constant 0 : index
    %c0_11 = arith.constant 0 : index
    %16 = vector.load %arg5[%c0_10, %c0_11] : memref<32x32xf32, #tpu.memory_space<vmem>>, vector<32x32xf32>
    %cst_12 = arith.constant dense<0.000000e+00> : vector<8x32xf32>
    %17 = tpu.matmul %15, %16, %cst_12 {dimension_numbers = #tpu.dot_dimension_numbers<[1], [0], [0], [1], [0, 0, 1, 1], [], []>} : vector<8x32xf32>, vector<32x32xf32>, vector<8x32xf32> -> vector<8x32xf32>
    %18 = arith.addf %14, %17 : vector<8x32xf32>
    %19 = math.tanh %18 : vector<8x32xf32>
    %cst_13 = arith.constant 1.000000e+00 : f32
    %20 = vector.broadcast %cst_13 : f32 to vector<8x32xf32>
    %21 = arith.subf %20, %12 : vector<8x32xf32>
    %22 = arith.mulf %21, %19 : vector<8x32xf32>
    %23 = arith.mulf %11, %1 : vector<8x32xf32>
    %24 = arith.addf %22, %23 : vector<8x32xf32>
    %c0_14 = arith.constant 0 : index
    %c0_15 = arith.constant 0 : index
    %25 = vector.load %arg7[%c0_14, %c0_15] : memref<8x32xf32, #tpu.memory_space<vmem>>, vector<8x32xf32>
    tpu.vector_store %arg7[%c0_14, %c0_15], %24 {strides = array<i32>} : memref<8x32xf32, #tpu.memory_space<vmem>>, vector<8x32xf32>,
    return
  }
  func.func @transform_0(%arg0: i32) -> (i32, i32) {
    %c0_i32 = arith.constant 0 : i32
    %c0_i32_0 = arith.constant 0 : i32
    return %arg0, %c0_i32 : i32, i32
  }
  func.func @transform_1(%arg0: i32) -> (i32, i32) {
    %c0_i32 = arith.constant 0 : i32
    %c0_i32_0 = arith.constant 0 : i32
    return %arg0, %c0_i32 : i32, i32
  }
  func.func @transform_2(%arg0: i32) -> (i32, i32) {
    %c0_i32 = arith.constant 0 : i32
    %c0_i32_0 = arith.constant 0 : i32
    %c0_i32_1 = arith.constant 0 : i32
    return %c0_i32, %c0_i32_0 : i32, i32
  }
  func.func @transform_3(%arg0: i32) -> (i32, i32) {
    %c0_i32 = arith.constant 0 : i32
    %c0_i32_0 = arith.constant 0 : i32
    %c0_i32_1 = arith.constant 0 : i32
    return %c0_i32, %c0_i32_0 : i32, i32
  }
  func.func @transform_4(%arg0: i32) -> (i32, i32) {
    %c0_i32 = arith.constant 0 : i32
    %c0_i32_0 = arith.constant 0 : i32
    %c0_i32_1 = arith.constant 0 : i32
    return %c0_i32, %c0_i32_0 : i32, i32
  }
  func.func @transform_5(%arg0: i32) -> (i32, i32) {
    %c0_i32 = arith.constant 0 : i32
    %c0_i32_0 = arith.constant 0 : i32
    %c0_i32_1 = arith.constant 0 : i32
    return %c0_i32, %c0_i32_0 : i32, i32
  }
  func.func @transform_6(%arg0: i32) -> (i32, i32) {
    %c0_i32 = arith.constant 0 : i32
    %c0_i32_0 = arith.constant 0 : i32
    return %arg0, %c0_i32 : i32, i32
  }
}

</mosaic_0001>

<bundles_post_ra>
// kernel: tpu_custom_call.1
= control target key start
LH: loop header
LB: loop body
LE: loop exit
PB: predicated region body
PF: predicated region fallthrough
CT: control target
= control target key end

     0   :  { %11 = vsyncpa [#allocation3], 0  ;;  %s733_s0 = inlined_call_operand.hbm [shape: f32[8,16], index: 0, kind: input, shape index: {}]   ;;  %s734_s1 = inlined_call_operand.hbm [shape: f32[8,32], index: 1, kind: input, shape index: {}]   ;;  %s735_s2 = inlined_call_operand.hbm [shape: f32[16,128], index: 2, kind: input, shape index: {}]   ;;  %s736_s3 = inlined_call_operand.hbm [shape: f32[32,128], index: 3, kind: input, shape index: {}]   ;;  %s737_s4 = inlined_call_operand.hbm [shape: f32[32,32], index: 4, kind: input, shape index: {}]   ;;  %s738_s5 = inlined_call_operand.vmem [shape: f32[1,128], index: 5, kind: input, shape index: {}]   ;;  %s739_s6 = inlined_call_operand.hbm [shape: f32[8,32], index: 6, kind: output, shape index: {}]  }
   0x1   :  { %12 = vsyncpa [#allocation6], 0 }
   0x2   :  { %13 = vsyncpa [#allocation9], 0 }
   0x3   :  { %14 = vsyncpa [#allocation4], 0  ;;  %s594_s21 = smov [#allocation5]   ;;  %s454_s25 = scalar_lea.hbm %s734_s1, 128 }
   0x4   :  { %s31_s22 = sshll.u32 %s594_s21, 4  ;;  %p455_p0 = scmp.ne.s32.totalorder %s734_s1, %s454_s25  ;;  %s32_s22 = int_to_ptr.vmem [resolvable:$true] %s31_s22 }
   0x5   :  { %p458_p1 = scmp.lt.u32.totalorder %s454_s25, %s734_s1 }
   0x7   :  { %p460_p2 = pnand %p458_p1, %p455_p0 }
   0x9   :  { %463 = shalt.err (!%p460_p2)
}
   0xa   :  { %s464_s30 = scalar_lea.vmem %s32_s22, 128  ;;  %p469_p4 = scmp.lt.s32.totalorder %s32_s22, %s32_s22 }
   0xb   :  { %p465_p3 = scmp.ne.s32.totalorder %s32_s22, %s464_s30  ;;  %p470_p5 = scmp.lt.s32.totalorder %s464_s30, %s464_s30 }
   0xd   :  { %p471_p6 = por %p470_p5, %p469_p4 }
   0xf   :  { %p472_p7 = pnand %p471_p6, %p465_p3 }
  0x11   :  { %475 = shalt.err (!%p472_p7)
}
  0x12   :  { %34 = dma.hbm_to_vmem [thread:$0]  %s734_s1, 128, %s32_s22, [#allocation6]  }
  0x13   :  { %s595_s9 = smov [#allocation8]   ;;  %s596_s11 = smov [#allocation2]  }
  0x14   :  { %s52_s10 = sshll.u32 %s595_s9, 4  ;;  %s21_s12 = sshll.u32 %s596_s11, 4  ;;  %s53_s10 = int_to_ptr.vmem [resolvable:$true] %s52_s10  ;;  %s22_s12 = int_to_ptr.vmem [resolvable:$true] %s21_s12 }
  0x15   :  { %s476_s15 = scalar_lea.hbm %s736_s3, 512 }
  0x16   :  { %p477_p8 = scmp.ne.s32.totalorder %s736_s3, %s476_s15  ;;  %p480_p9 = scmp.lt.u32.totalorder %s476_s15, %s736_s3 }
  0x18   :  { %p482_p10 = pnand %p480_p9, %p477_p8 }
  0x1a   :  { %485 = shalt.err (!%p482_p10)
}
  0x1b   :  { %s486_s1 = scalar_lea.vmem %s53_s10, 512  ;;  %p491_p12 = scmp.lt.s32.totalorder %s53_s10, %s53_s10 }
  0x1c   :  { %p487_p11 = scmp.ne.s32.totalorder %s53_s10, %s486_s1  ;;  %p492_p13 = scmp.lt.s32.totalorder %s486_s1, %s486_s1 }
  0x1e   :  { %p493_p0 = por %p492_p13, %p491_p12 }
  0x20   :  { %p494_p1 = pnand %p493_p0, %p487_p11 }
  0x22   :  { %497 = shalt.err (!%p494_p1)
}
  0x23   :  { %s597_s20 = smov 128   ;;  %s598_s21 = smov 8  }
  0x24   :  { %58 = dma.hbm_to_vmem [thread:$0]  %s736_s3, 512, %s53_s10, [#allocation9], %s597_s20, %s597_s20, %s598_s21  }
  0x25   :  { %s498_s26 = scalar_lea.hbm %s733_s0, 128 }
  0x26   :  { %p499_p2 = scmp.ne.s32.totalorder %s733_s0, %s498_s26  ;;  %p502_p3 = scmp.lt.u32.totalorder %s498_s26, %s733_s0 }
  0x28   :  { %p504_p4 = pnand %p502_p3, %p499_p2 }
  0x2a   :  { %507 = shalt.err (!%p504_p4)
}
  0x2b   :  { %s508_s7 = scalar_lea.vmem %s22_s12, 128  ;;  %p513_p6 = scmp.lt.s32.totalorder %s22_s12, %s22_s12 }
  0x2c   :  { %p509_p5 = scmp.ne.s32.totalorder %s22_s12, %s508_s7  ;;  %p514_p7 = scmp.lt.s32.totalorder %s508_s7, %s508_s7 }
  0x2e   :  { %p515_p8 = por %p514_p7, %p513_p6 }
  0x30   :  { %p516_p9 = pnand %p515_p8, %p509_p5 }
  0x32   :  { %519 = shalt.err (!%p516_p9)
}
  0x33   :  { %24 = dma.hbm_to_vmem [thread:$0]  %s733_s0, 128, %s22_s12, [#allocation3]  }
  0x34   :  { %s599_s9 = smov [#allocation7]   ;;  %s600_s11 = smov [#allocation10]  }
  0x35   :  { %s40_s10 = sshll.u32 %s599_s9, 4  ;;  %s64_s13 = sshll.u32 %s600_s11, 4  ;;  %s41_s10 = int_to_ptr.vmem [resolvable:$true] %s40_s10  ;;  %s65_s13 = int_to_ptr.vmem [resolvable:$true] %s64_s13 }
  0x36   :  { %s520_s16 = scalar_lea.hbm %s735_s2, 256 }
  0x37   :  { %p521_p10 = scmp.ne.s32.totalorder %s735_s2, %s520_s16  ;;  %p524_p11 = scmp.lt.u32.totalorder %s520_s16, %s735_s2 }
  0x39   :  { %p526_p12 = pnand %p524_p11, %p521_p10 }
  0x3b   :  { %529 = shalt.err (!%p526_p12)
}
  0x3c   :  { %s530_s0 = scalar_lea.vmem %s41_s10, 256  ;;  %p535_p0 = scmp.lt.s32.totalorder %s41_s10, %s41_s10 }
  0x3d   :  { %p531_p13 = scmp.ne.s32.totalorder %s41_s10, %s530_s0  ;;  %p536_p1 = scmp.lt.s32.totalorder %s530_s0, %s530_s0 }
  0x3f   :  { %p537_p2 = por %p536_p1, %p535_p0 }
  0x41   :  { %p538_p3 = pnand %p537_p2, %p531_p13 }
  0x43   :  { %541 = shalt.err (!%p538_p3)
}
  0x44   :  { %46 = dma.hbm_to_vmem [thread:$0]  %s735_s2, 256, %s41_s10, [#allocation6], %s597_s20, %s597_s20, %s598_s21  }
  0x45   :  { %s542_s25 = scalar_lea.hbm %s737_s4, 512 }
  0x46   :  { %p543_p4 = scmp.ne.s32.totalorder %s737_s4, %s542_s25  ;;  %p546_p5 = scmp.lt.u32.totalorder %s542_s25, %s737_s4 }
  0x48   :  { %p548_p6 = pnand %p546_p5, %p543_p4 }
  0x4a   :  { %551 = shalt.err (!%p548_p6)
}
  0x4b   :  { %s552_s30 = scalar_lea.vmem %s65_s13, 512  ;;  %p557_p8 = scmp.lt.s32.totalorder %s65_s13, %s65_s13 }
  0x4c   :  { %p553_p7 = scmp.ne.s32.totalorder %s65_s13, %s552_s30  ;;  %p558_p9 = scmp.lt.s32.totalorder %s552_s30, %s552_s30 }
  0x4e   :  { %p559_p10 = por %p558_p9, %p557_p8 }
  0x50   :  { %p560_p11 = pnand %p559_p10, %p553_p7 }
  0x52   :  { %563 = shalt.err (!%p560_p11)
}
  0x53   :  { %70 = dma.hbm_to_vmem [thread:$0]  %s737_s4, 512, %s65_s13, [#allocation9], %s597_s20, %s597_s20, %s598_s21  }
  0x54   :  { %586 = dma.done.wait [#allocation3], 128  }
  0x55   :  { %587 = vsyncadd [#allocation3], 4294967168 }
  0x56   :  { %588 = dma.done.wait [#allocation6], 384  }
  0x57   :  { %589 = vsyncadd [#allocation6], 4294966912 }
  0x58   :  { %590 = dma.done.wait [#allocation9], 1024  }
  0x59   :  { %591 = vsyncadd [#allocation9], 4294966272  ;;  %v601_v0 = vmov 0.0|0.0   ;;  %vm602_vm0 = vmmov 0   ;;  %v603_v1 = vmov 0.0   ;;  %v92_v2 = vld [vmem:[#allocation8] sm:$0xff] }
  0x5a   :  { %421 = vmatprep.subr.bf16.mxu0 %v601_v0  ;;  %427 = vmatprep.subr.bf16.mxu1 %v601_v0  ;;  %v93_v3 = vld [vmem:[#allocation8 + $0x8] sm:$0xff]  ;;  %v90_v4 = vld [vmem:[#allocation7] sm:$0xff]  ;;  %v91_v6 = vld [vmem:[#allocation7 + $0x8] sm:$0xff]  ;;  %vm170_vm1 = vcmask 130048   ;;  %vm96_vm2 = vcmask 261120   ;;  %s604_s21 = smov 64  }
  0x5b   :  { %407 = vmatprep.mubr.msk.f32.mxu1 %vm602_vm0, %v603_v1  ;;  %400 = vmatprep.mubr.msk.f32.mxu0 %vm602_vm0, %v603_v1  ;;  %v422_v5 = vpack.c.bf16 %v93_v3, %v92_v2  ;;  %v94_v7 = vld [vmem:[#allocation8 + $0x10] sm:$0xff]  ;;  %v95_v8 = vld [vmem:[#allocation8 + $0x18] sm:$0xff]  ;;  %v428_v9 = vpack.c.bf16 %v91_v6, %v90_v4  ;;  %v88_v11 = vld [vmem:[#allocation2] sm:$0xff]  ;;  %s605_s3 = smov 96   ;;  %s607_s8 = smov [#allocation11]  }
  0x5c   :  { %v425_v10 = vpack.c.bf16 %v95_v8, %v94_v7  ;;  %v89_v12 = vld [vmem:[#allocation5] sm:$0xff]  ;;  %v258_v13 = vld [vmem:[#allocation10] sm:$0xff]  ;;  %v260_v15 = vld [vmem:[#allocation10 + $0x10] sm:$0xff]  ;;  %s364_s9 = sshll.u32 %s607_s8, 4  ;;  %s365_s9 = int_to_ptr.vmem [resolvable:$true] %s364_s9 }
  0x5d   :  { %423 = vmatpush3.bf16.msra.mxu0 %v422_v5  ;;  %429 = vmatpush3.bf16.msra.mxu1 %v428_v9  ;;  %v259_v14 = vld [vmem:[#allocation10 + $0x8] sm:$0xff]  ;;  %v261_v17 = vld [vmem:[#allocation10 + $0x18] sm:$0xff]  ;;  %v377_v22 = vld [vmem:[%s738_s5] ss:$0 sm:$0xff]  ;;  %s606_s5 = smov 32   ;;  %s564_s10 = scalar_lea.vmem %s365_s9, 128 }
  0x5e   :  { %424 = vmatprep.subr.bf16.mxu0 %v601_v0  ;;  %430 = vmatprep.subr.bf16.mxu1 %v601_v0  ;;  %v431_v16 = vpack.c.bf16 %v259_v14, %v258_v13  ;;  %v434_v18 = vpack.c.bf16 %v261_v17, %v260_v15  ;;  %p565_p12 = scmp.ne.s32.totalorder %s365_s9, %s564_s10  ;;  %p569_p13 = scmp.lt.s32.totalorder %s365_s9, %s365_s9 }
  0x5f   :  { %p570_p0 = scmp.lt.s32.totalorder %s564_s10, %s564_s10 }
  0x60   :  { %408 = vmatmul.mubr.msk.f32.vlgmr.msra.gmra.mrb[0].mxu1 %vm170_vm1, %v88_v11 }
  0x61   :  { %426 = vmatpush3.bf16.msra.mxu0 %v425_v10  ;;  %418 = vmatprep.mubr.msk.f32.mxu1 %vm602_vm0, %v603_v1  ;;  %p571_p1 = por %p570_p0, %p569_p13 }
  0x62   :  { %432 = vmatpush3.bf16.msra.mxu1 %v431_v16 }
  0x63   :  { %433 = vmatprep.subr.bf16.mxu1 %v601_v0  ;;  %p572_p2 = pnand %p571_p1, %p565_p12 }
  0x64   :  { %401 = vmatmul.mubr.msk.f32.vlgmr.msra.gmra.mrb[0].mxu0 %vm96_vm2, %v89_v12 }
  0x66   :  { %435 = vmatpush3.bf16.msra.mxu1 %v434_v18 }
 0x133   :  { %v240_v19 = vpop.f32.mrb[0].mxu1 }
 0x134   :  { %v409_v20 = vpop.f32.mrb[1].mxu1 }
 0x137   :  { %v166_v21 = vpop.f32.mrb[0].mxu0 }
 0x138   :  { %v241_v23 = vadd.f32 %v240_v19, %v166_v21  ;;  %v402_v24 = vpop.f32.mrb[1].mxu0 }
 0x13a   :  { %v251_v25 = vadd.f32 %v377_v22, %v241_v23 }
 0x13c   :  { %450 = vtanh.f32 %v251_v25 }
 0x146   :  { %v451_v26 = vpop.eup %450 }
 0x147   :  { %254 = vrot.lane.b32.xlu0 %v451_v26, %s604_s21  ;;  %v347_v34 = vmul.f32 %v451_v26, %v89_v12  ;;  %v341_v36 = vsub.f32 1.0, %v451_v26 }
 0x1b9   :  { %v255_v27 = vpop.permute.xlu0 %254 }
 0x1ba   :  { %v257_v28 = vmul.f32 %v255_v27, %v89_v12 }
 0x1bc   :  { %419 = vmatmul.mubr.msk.f32.vlgmr.msra.gmra.mrb[2].mxu1 %vm96_vm2, %v257_v28 }
 0x28f   :  { %v331_v29 = vpop.f32.mrb[2].mxu1 }
 0x290   :  { %336 = vrot.lane.b32.xlu0 %v331_v29, %s605_s3  ;;  %v420_v30 = vpop.f32.mrb[3].mxu1 }
 0x302   :  { %v337_v31 = vpop.permute.xlu0 %336 }
 0x303   :  { %v339_v32 = vadd.f32 %v337_v31, %v251_v25 }
 0x305   :  { %452 = vtanh.f32 %v339_v32 }
 0x30f   :  { %v453_v33 = vpop.eup %452 }
 0x310   :  { %343 = vrot.lane.b32.xlu1 %v453_v33, %s604_s21 }
 0x314   :  { %349 = vrot.lane.b32.xlu1 %v347_v34, %s606_s5 }
 0x382   :  { %v344_v35 = vpop.permute.xlu1 %343 }
 0x383   :  { %v346_v37 = vmul.f32 %v344_v35, %v341_v36 }
 0x386   :  { %v350_v38 = vpop.permute.xlu1 %349 }
 0x387   :  { %v352_v39 = vadd.f32 %v350_v38, %v346_v37 }
 0x389   :  { %354 = vrot.lane.b32.xlu0 %v352_v39, %s605_s3 }
 0x3fb   :  { %v355_v40 = vpop.permute.xlu0 %354 }
 0x3fc   :  { %357 = vst.msk [vmem:[#allocation11] sm:$0xff] %vm96_vm2, %v355_v40 }
 0x3fd   :  { %575 = shalt.err (!%p572_p2)
}
 0x3fe   :  { %s576_s14 = scalar_lea.hbm %s739_s6, 128 }
 0x3ff   :  { %p577_p3 = scmp.ne.s32.totalorder %s739_s6, %s576_s14  ;;  %p580_p4 = scmp.lt.u32.totalorder %s576_s14, %s739_s6 }
 0x401   :  { %p582_p5 = pnand %p580_p4, %p577_p3 }
 0x403   :  { %585 = shalt.err (!%p582_p5)
}
 0x404   :  { %367 = dma.vmem_to_hbm [thread:$0]  %s365_s9, 128, %s739_s6, [#allocation4]  }
 0x405   :  { %592 = dma.done.wait [#allocation4], 128  }
 0x406   :  { %593 = vsyncadd [#allocation4], 4294967168 }
 0x407   :  { %371 = vsyncpa [#allocation3], 1 }
 0x408   :  { %372 = vsyncpa [#allocation6], 1 }
 0x409   :  { %373 = vsyncpa [#allocation9], 1 }
 0x40a   :  { %374 = vsyncpa [#allocation4], 1 }

</bundles_post_ra>
